<compile_context>
chip_gen: v5e
topology: v5e:2x2
jax: 0.10.0
libtpu: 0.0.40
codegen_flags: <defaults>
</compile_context>

<pallas_src>
import math

import jax
import jax.numpy as jnp
from jax import lax
from jax.experimental import pallas as pl
from jax.experimental.pallas import tpu as pltpu

# ---- problem sizes (small, consistent with the module) ----------------------
BATCH = 2
SEQ_Q = 8      # query (slot) length
SEQ_K = 8      # key/value (utterance) length
HID = 32       # hid_dim
HEADS = 4
D_K = HID // HEADS


def mha_kernel(q_ref, k_ref, v_ref, w_ref, b_ref, attn_ref, x_ref):
    """Whole forward pass in one invocation (no grid).

    q_ref: (B, SQ, HID)     k_ref / v_ref: (B, SK, HID)
    w_ref: (HID, 4*HID)     packed [Wq/sqrt(d_k) | Wk | Wv | Wo]
    b_ref: (1, 4*HID)       packed [bq/sqrt(d_k) | bk | bv | bo]
    attn_ref: (B, HEADS, SQ, SK)     x_ref: (B, SQ, HID)
    """
    B, SQ, hid = q_ref.shape
    SK = k_ref.shape[1]
    heads = attn_ref.shape[1]
    d_k = hid // heads

    w = w_ref[...]                                   # (32, 128) — full lane width
    b = b_ref[...]                                   # (1, 128)

    # Fuse the three projections: stack the (B*S, HID) slabs along sublanes and do
    # a single (48, 32) @ (32, 128) MXU matmul + one bias broadcast-add.
    lhs = jnp.concatenate(
        [q_ref[...].reshape(B * SQ, hid),
         k_ref[...].reshape(B * SK, hid),
         v_ref[...].reshape(B * SK, hid)], axis=0)                 # (48, 32)
    proj = jnp.dot(lhs, w, preferred_element_type=jnp.float32) + b  # (48, 128)

    rq, rk, rv = 0, B * SQ, B * (SQ + SK)            # row offsets of each stream

    # Head split: (rows, HID) -> (B*heads, S, d_k) via per-head lane slices + stack.
    # (Kept as the proven lowering path; see module docstring.)
    def split_heads(row0, col0, seq):
        per_head = [
            proj[row0:row0 + B * seq,
                 col0 + h * d_k:col0 + (h + 1) * d_k].reshape(B, seq, d_k)
            for h in range(heads)]
        return jnp.stack(per_head, axis=1).reshape(B * heads, seq, d_k)

    qh = split_heads(rq, 0 * hid, SQ)   # 1/sqrt(d_k) already folded into Wq/bq
    kh = split_heads(rk, 1 * hid, SK)
    vh = split_heads(rv, 2 * hid, SK)

    # Batched QK^T over the fused (batch*head) axis: (B*heads, SQ, SK).
    s = lax.dot_general(qh, kh, (((2,), (2,)), ((0,), (0,))),
                        preferred_element_type=jnp.float32)

    # Numerically-stable softmax; EUP approx reciprocal + one NR refinement step.
    m = jnp.max(s, axis=-1, keepdims=True)
    e = jnp.exp(s - m)
    denom = jnp.sum(e, axis=-1, keepdims=True)
    r = pl.reciprocal(denom, approx=True)
    r = r * (2.0 - denom * r)                        # Newton-Raphson: err -> err^2
    p = e * r

    attn_ref[...] = p.reshape(B, heads, SQ, SK)      # single store of attn tensor

    # dropout == identity at inference; batched PV: (B*heads, SQ, d_k)
    ctx = lax.dot_general(p, vh, (((2,), (1,)), ((0,), (0,))),
                          preferred_element_type=jnp.float32)

    # Merge heads back along lanes (matches transpose(1,2)+view): (B*SQ, HID)
    ctx4 = ctx.reshape(B, heads, SQ, d_k)
    x_flat = jnp.concatenate([ctx4[:, h] for h in range(heads)],
                             axis=-1).reshape(B * SQ, hid)

    # Output projection through the same packed operand (Wo = columns 3*hid:4*hid).
    out_all = jnp.dot(x_flat, w, preferred_element_type=jnp.float32) + b
    x_ref[...] = out_all[:, 3 * hid:4 * hid].reshape(B, SQ, hid)


def pack_params(params):
    """One-time parameter prep (off the hot path): pack the four projections into a
    single lane-dense operand and fold 1/sqrt(d_k) into the Wq/bq columns."""
    wq, bq, wk, bk, wv, bv, wo, bo = params
    scale = 1.0 / math.sqrt(D_K)
    w_packed = jnp.concatenate([wq * scale, wk, wv, wo], axis=1)   # (HID, 4*HID)
    b_packed = jnp.concatenate([bq * scale, bk, bv, bo], axis=1)   # (1, 4*HID)
    return w_packed, b_packed


def multi_head_attention(Q, K, V, w_packed, b_packed):
    """Q: (B, SQ, HID), K/V: (B, SK, HID). Returns (attn_scores, X) like the module."""
    B, seq_q, _ = Q.shape
    seq_k = K.shape[1]

    vmem = pltpu.MemorySpace.VMEM
    attn_scores, X = pl.pallas_call(
        mha_kernel,
        in_specs=[pl.BlockSpec(memory_space=vmem) for _ in range(5)],
        out_specs=(pl.BlockSpec(memory_space=vmem),
                   pl.BlockSpec(memory_space=vmem)),
        out_shape=(
            jax.ShapeDtypeStruct((B, HEADS, seq_q, seq_k), jnp.float32),
            jax.ShapeDtypeStruct((B, seq_q, HID), jnp.float32),
        ),
    )(Q, K, V, w_packed, b_packed)
    return attn_scores, X


def reference_mha(Q, K, V, params):
    """Pure-JAX reference mirroring the PyTorch forward (mask=None, eval)."""
    wq, bq, wk, bk, wv, bv, wo, bo = params
    B = Q.shape[0]

    def proj(x, w, b):
        return x @ w + b[0]

    q = proj(Q, wq, bq).reshape(B, -1, HEADS, D_K).transpose(0, 2, 1, 3)
    k = proj(K, wk, bk).reshape(B, -1, HEADS, D_K).transpose(0, 2, 1, 3)
    v = proj(V, wv, bv).reshape(B, -1, HEADS, D_K).transpose(0, 2, 1, 3)
    scores = jnp.einsum("bhqd,bhkd->bhqk", q, k) / math.sqrt(D_K)
    attn = jax.nn.softmax(scores, axis=-1)
    x = jnp.einsum("bhqk,bhkd->bhqd", attn, v)
    x = x.transpose(0, 2, 1, 3).reshape(B, -1, HID)
    return attn, x @ wo + bo[0]


if __name__ == "__main__":
    key = jax.random.PRNGKey(0)
    keys = jax.random.split(key, 12)

    # deterministic synthetic parameters (nn.Linear(hid, hid) weights stored as W.T)
    bound = 1.0 / math.sqrt(HID)

    def init_w(k):
        return jax.random.uniform(k, (HID, HID), jnp.float32, -bound, bound)

    def init_b(k):
        return jax.random.uniform(k, (1, HID), jnp.float32, -bound, bound)

    params = (
        init_w(keys[0]), init_b(keys[1]),   # W_q, b_q
        init_w(keys[2]), init_b(keys[3]),   # W_k, b_k
        init_w(keys[4]), init_b(keys[5]),   # W_v, b_v
        init_w(keys[6]), init_b(keys[7]),   # out
    )
    # One-time packing (hoisted out of the per-call path).
    w_packed, b_packed = pack_params(params)
    jax.block_until_ready((w_packed, b_packed))

    Q = jax.random.normal(keys[8], (BATCH, SEQ_Q, HID), jnp.float32)
    K = jax.random.normal(keys[9], (BATCH, SEQ_K, HID), jnp.float32)
    V = jax.random.normal(keys[10], (BATCH, SEQ_K, HID), jnp.float32)

    attn, X = multi_head_attention(Q, K, V, w_packed, b_packed)
    jax.block_until_ready((attn, X))

    attn_ref, X_ref = reference_mha(Q, K, V, params)
    assert jnp.allclose(attn, attn_ref, atol=1e-5, rtol=1e-5), "attn mismatch"
    assert jnp.allclose(X, X_ref, atol=1e-5, rtol=1e-5), "output mismatch"

    print("KERNEL_OK")
</pallas_src>

<mosaic_0001>
module attributes {stable_mosaic.version = 11 : i64} {
  func.func @mha_kernel(%arg0: memref<2x8x32xf32, #tpu.memory_space<vmem>>, %arg1: memref<2x8x32xf32, #tpu.memory_space<vmem>>, %arg2: memref<2x8x32xf32, #tpu.memory_space<vmem>>, %arg3: memref<32x128xf32, #tpu.memory_space<vmem>>, %arg4: memref<1x128xf32, #tpu.memory_space<vmem>>, %arg5: memref<2x4x8x8xf32, #tpu.memory_space<vmem>>, %arg6: memref<2x8x32xf32, #tpu.memory_space<vmem>>) attributes {dimension_semantics = [], scalar_prefetch = 0 : i64, scratch_operands = 0 : i64, tpu.core_type = #tpu.core_type<tc>} {
    %c0 = arith.constant 0 : index
    %c0_0 = arith.constant 0 : index
    %0 = vector.load %arg3[%c0, %c0_0] : memref<32x128xf32, #tpu.memory_space<vmem>>, vector<32x128xf32>
    %c0_1 = arith.constant 0 : index
    %c0_2 = arith.constant 0 : index
    %1 = vector.load %arg4[%c0_1, %c0_2] : memref<1x128xf32, #tpu.memory_space<vmem>>, vector<1x128xf32>
    %c0_3 = arith.constant 0 : index
    %c0_4 = arith.constant 0 : index
    %c0_5 = arith.constant 0 : index
    %2 = vector.load %arg0[%c0_3, %c0_4, %c0_5] : memref<2x8x32xf32, #tpu.memory_space<vmem>>, vector<2x8x32xf32>
    %3 = vector.shape_cast %2 : vector<2x8x32xf32> to vector<16x32xf32>
    %c0_6 = arith.constant 0 : index
    %c0_7 = arith.constant 0 : index
    %c0_8 = arith.constant 0 : index
    %4 = vector.load %arg1[%c0_6, %c0_7, %c0_8] : memref<2x8x32xf32, #tpu.memory_space<vmem>>, vector<2x8x32xf32>
    %5 = vector.shape_cast %4 : vector<2x8x32xf32> to vector<16x32xf32>
    %c0_9 = arith.constant 0 : index
    %c0_10 = arith.constant 0 : index
    %c0_11 = arith.constant 0 : index
    %6 = vector.load %arg2[%c0_9, %c0_10, %c0_11] : memref<2x8x32xf32, #tpu.memory_space<vmem>>, vector<2x8x32xf32>
    %7 = vector.shape_cast %6 : vector<2x8x32xf32> to vector<16x32xf32>
    %8 = tpu.concatenate %3, %5, %7 in 0 : vector<16x32xf32>, vector<16x32xf32>, vector<16x32xf32> -> vector<48x32xf32>
    %cst = arith.constant dense<0.000000e+00> : vector<48x128xf32>
    %9 = tpu.matmul %8, %0, %cst {dimension_numbers = #tpu.dot_dimension_numbers<[1], [0], [0], [1], [0, 0, 1, 1], [], []>} : vector<48x32xf32>, vector<32x128xf32>, vector<48x128xf32> -> vector<48x128xf32>
    %10 = vector.broadcast %1 : vector<1x128xf32> to vector<48x128xf32>
    %11 = arith.addf %9, %10 : vector<48x128xf32>
    %12 = vector.extract_strided_slice %11 {offsets = [0, 0], sizes = [16, 8], strides = [1, 1]} : vector<48x128xf32> to vector<16x8xf32>
    %13 = vector.shape_cast %12 : vector<16x8xf32> to vector<2x8x8xf32>
    %14 = vector.extract_strided_slice %11 {offsets = [0, 8], sizes = [16, 8], strides = [1, 1]} : vector<48x128xf32> to vector<16x8xf32>
    %15 = vector.shape_cast %14 : vector<16x8xf32> to vector<2x8x8xf32>
    %16 = vector.extract_strided_slice %11 {offsets = [0, 16], sizes = [16, 8], strides = [1, 1]} : vector<48x128xf32> to vector<16x8xf32>
    %17 = vector.shape_cast %16 : vector<16x8xf32> to vector<2x8x8xf32>
    %18 = vector.extract_strided_slice %11 {offsets = [0, 24], sizes = [16, 8], strides = [1, 1]} : vector<48x128xf32> to vector<16x8xf32>
    %19 = vector.shape_cast %18 : vector<16x8xf32> to vector<2x8x8xf32>
    %20 = vector.shape_cast %13 : vector<2x8x8xf32> to vector<2x1x8x8xf32>
    %21 = vector.shape_cast %15 : vector<2x8x8xf32> to vector<2x1x8x8xf32>
    %22 = vector.shape_cast %17 : vector<2x8x8xf32> to vector<2x1x8x8xf32>
    %23 = vector.shape_cast %19 : vector<2x8x8xf32> to vector<2x1x8x8xf32>
    %24 = tpu.concatenate %20, %21, %22, %23 in 1 : vector<2x1x8x8xf32>, vector<2x1x8x8xf32>, vector<2x1x8x8xf32>, vector<2x1x8x8xf32> -> vector<2x4x8x8xf32>
    %25 = vector.shape_cast %24 : vector<2x4x8x8xf32> to vector<8x8x8xf32>
    %26 = vector.extract_strided_slice %11 {offsets = [16, 32], sizes = [16, 8], strides = [1, 1]} : vector<48x128xf32> to vector<16x8xf32>
    %27 = vector.shape_cast %26 : vector<16x8xf32> to vector<2x8x8xf32>
    %28 = vector.extract_strided_slice %11 {offsets = [16, 40], sizes = [16, 8], strides = [1, 1]} : vector<48x128xf32> to vector<16x8xf32>
    %29 = vector.shape_cast %28 : vector<16x8xf32> to vector<2x8x8xf32>
    %30 = vector.extract_strided_slice %11 {offsets = [16, 48], sizes = [16, 8], strides = [1, 1]} : vector<48x128xf32> to vector<16x8xf32>
    %31 = vector.shape_cast %30 : vector<16x8xf32> to vector<2x8x8xf32>
    %32 = vector.extract_strided_slice %11 {offsets = [16, 56], sizes = [16, 8], strides = [1, 1]} : vector<48x128xf32> to vector<16x8xf32>
    %33 = vector.shape_cast %32 : vector<16x8xf32> to vector<2x8x8xf32>
    %34 = vector.shape_cast %27 : vector<2x8x8xf32> to vector<2x1x8x8xf32>
    %35 = vector.shape_cast %29 : vector<2x8x8xf32> to vector<2x1x8x8xf32>
    %36 = vector.shape_cast %31 : vector<2x8x8xf32> to vector<2x1x8x8xf32>
    %37 = vector.shape_cast %33 : vector<2x8x8xf32> to vector<2x1x8x8xf32>
    %38 = tpu.concatenate %34, %35, %36, %37 in 1 : vector<2x1x8x8xf32>, vector<2x1x8x8xf32>, vector<2x1x8x8xf32>, vector<2x1x8x8xf32> -> vector<2x4x8x8xf32>
    %39 = vector.shape_cast %38 : vector<2x4x8x8xf32> to vector<8x8x8xf32>
    %40 = vector.extract_strided_slice %11 {offsets = [32, 64], sizes = [16, 8], strides = [1, 1]} : vector<48x128xf32> to vector<16x8xf32>
    %41 = vector.shape_cast %40 : vector<16x8xf32> to vector<2x8x8xf32>
    %42 = vector.extract_strided_slice %11 {offsets = [32, 72], sizes = [16, 8], strides = [1, 1]} : vector<48x128xf32> to vector<16x8xf32>
    %43 = vector.shape_cast %42 : vector<16x8xf32> to vector<2x8x8xf32>
    %44 = vector.extract_strided_slice %11 {offsets = [32, 80], sizes = [16, 8], strides = [1, 1]} : vector<48x128xf32> to vector<16x8xf32>
    %45 = vector.shape_cast %44 : vector<16x8xf32> to vector<2x8x8xf32>
    %46 = vector.extract_strided_slice %11 {offsets = [32, 88], sizes = [16, 8], strides = [1, 1]} : vector<48x128xf32> to vector<16x8xf32>
    %47 = vector.shape_cast %46 : vector<16x8xf32> to vector<2x8x8xf32>
    %48 = vector.shape_cast %41 : vector<2x8x8xf32> to vector<2x1x8x8xf32>
    %49 = vector.shape_cast %43 : vector<2x8x8xf32> to vector<2x1x8x8xf32>
    %50 = vector.shape_cast %45 : vector<2x8x8xf32> to vector<2x1x8x8xf32>
    %51 = vector.shape_cast %47 : vector<2x8x8xf32> to vector<2x1x8x8xf32>
    %52 = tpu.concatenate %48, %49, %50, %51 in 1 : vector<2x1x8x8xf32>, vector<2x1x8x8xf32>, vector<2x1x8x8xf32>, vector<2x1x8x8xf32> -> vector<2x4x8x8xf32>
    %53 = vector.shape_cast %52 : vector<2x4x8x8xf32> to vector<8x8x8xf32>
    %cst_12 = arith.constant dense<0.000000e+00> : vector<8x8x8xf32>
    %54 = tpu.matmul %25, %39, %cst_12 {dimension_numbers = #tpu.dot_dimension_numbers<[2], [2], [1], [1], [0, 0, 0, 1, 1, 1], [0], [0]>} : vector<8x8x8xf32>, vector<8x8x8xf32>, vector<8x8x8xf32> -> vector<8x8x8xf32>
    %cst_13 = arith.constant dense<0xFF800000> : vector<8x8xf32>
    %55 = vector.multi_reduction <maximumf>, %54, %cst_13 [2] : vector<8x8x8xf32> to vector<8x8xf32>
    %56 = vector.shape_cast %55 : vector<8x8xf32> to vector<8x8x1xf32>
    %57 = vector.broadcast %56 : vector<8x8x1xf32> to vector<8x8x8xf32>
    %58 = arith.subf %54, %57 : vector<8x8x8xf32>
    %59 = math.exp %58 : vector<8x8x8xf32>
    %cst_14 = arith.constant dense<0.000000e+00> : vector<8x8xf32>
    %60 = vector.multi_reduction <add>, %59, %cst_14 [2] : vector<8x8x8xf32> to vector<8x8xf32>
    %61 = vector.shape_cast %60 : vector<8x8xf32> to vector<8x8x1xf32>
    %62 = tpu.reciprocal %61 {approx = true} : vector<8x8x1xf32> -> vector<8x8x1xf32>
    %63 = arith.mulf %61, %62 : vector<8x8x1xf32>
    %cst_15 = arith.constant 2.000000e+00 : f32
    %64 = vector.broadcast %cst_15 : f32 to vector<8x8x1xf32>
    %65 = arith.subf %64, %63 : vector<8x8x1xf32>
    %66 = arith.mulf %62, %65 : vector<8x8x1xf32>
    %67 = vector.broadcast %66 : vector<8x8x1xf32> to vector<8x8x8xf32>
    %68 = arith.mulf %59, %67 : vector<8x8x8xf32>
    %69 = vector.shape_cast %68 : vector<8x8x8xf32> to vector<2x4x8x8xf32>
    %c0_16 = arith.constant 0 : index
    %c0_17 = arith.constant 0 : index
    %c0_18 = arith.constant 0 : index
    %c0_19 = arith.constant 0 : index
    %70 = vector.load %arg5[%c0_16, %c0_17, %c0_18, %c0_19] : memref<2x4x8x8xf32, #tpu.memory_space<vmem>>, vector<2x4x8x8xf32>
    tpu.vector_store %arg5[%c0_16, %c0_17, %c0_18, %c0_19], %69 {strides = array<i32>} : memref<2x4x8x8xf32, #tpu.memory_space<vmem>>, vector<2x4x8x8xf32>,
    %cst_20 = arith.constant dense<0.000000e+00> : vector<8x8x8xf32>
    %71 = tpu.matmul %68, %53, %cst_20 {dimension_numbers = #tpu.dot_dimension_numbers<[2], [1], [1], [2], [0, 0, 0, 1, 1, 2], [0], [0]>} : vector<8x8x8xf32>, vector<8x8x8xf32>, vector<8x8x8xf32> -> vector<8x8x8xf32>
    %72 = vector.shape_cast %71 : vector<8x8x8xf32> to vector<2x4x8x8xf32>
    %73 = vector.extract_strided_slice %72 {offsets = [0, 0, 0, 0], sizes = [2, 1, 8, 8], strides = [1, 1, 1, 1]} : vector<2x4x8x8xf32> to vector<2x1x8x8xf32>
    %74 = vector.shape_cast %73 : vector<2x1x8x8xf32> to vector<2x8x8xf32>
    %75 = vector.extract_strided_slice %72 {offsets = [0, 1, 0, 0], sizes = [2, 1, 8, 8], strides = [1, 1, 1, 1]} : vector<2x4x8x8xf32> to vector<2x1x8x8xf32>
    %76 = vector.shape_cast %75 : vector<2x1x8x8xf32> to vector<2x8x8xf32>
    %77 = vector.extract_strided_slice %72 {offsets = [0, 2, 0, 0], sizes = [2, 1, 8, 8], strides = [1, 1, 1, 1]} : vector<2x4x8x8xf32> to vector<2x1x8x8xf32>
    %78 = vector.shape_cast %77 : vector<2x1x8x8xf32> to vector<2x8x8xf32>
    %79 = vector.extract_strided_slice %72 {offsets = [0, 3, 0, 0], sizes = [2, 1, 8, 8], strides = [1, 1, 1, 1]} : vector<2x4x8x8xf32> to vector<2x1x8x8xf32>
    %80 = vector.shape_cast %79 : vector<2x1x8x8xf32> to vector<2x8x8xf32>
    %81 = tpu.concatenate %74, %76, %78, %80 in 2 : vector<2x8x8xf32>, vector<2x8x8xf32>, vector<2x8x8xf32>, vector<2x8x8xf32> -> vector<2x8x32xf32>
    %82 = vector.shape_cast %81 : vector<2x8x32xf32> to vector<16x32xf32>
    %cst_21 = arith.constant dense<0.000000e+00> : vector<16x128xf32>
    %83 = tpu.matmul %82, %0, %cst_21 {dimension_numbers = #tpu.dot_dimension_numbers<[1], [0], [0], [1], [0, 0, 1, 1], [], []>} : vector<16x32xf32>, vector<32x128xf32>, vector<16x128xf32> -> vector<16x128xf32>
    %84 = vector.broadcast %1 : vector<1x128xf32> to vector<16x128xf32>
    %85 = arith.addf %83, %84 : vector<16x128xf32>
    %86 = vector.extract_strided_slice %85 {offsets = [0, 96], sizes = [16, 32], strides = [1, 1]} : vector<16x128xf32> to vector<16x32xf32>
    %87 = vector.shape_cast %86 : vector<16x32xf32> to vector<2x8x32xf32>
    %c0_22 = arith.constant 0 : index
    %c0_23 = arith.constant 0 : index
    %c0_24 = arith.constant 0 : index
    %88 = vector.load %arg6[%c0_22, %c0_23, %c0_24] : memref<2x8x32xf32, #tpu.memory_space<vmem>>, vector<2x8x32xf32>
    tpu.vector_store %arg6[%c0_22, %c0_23, %c0_24], %87 {strides = array<i32>} : memref<2x8x32xf32, #tpu.memory_space<vmem>>, vector<2x8x32xf32>,
    return
  }
}

</mosaic_0001>

<bundles_post_ra>
// kernel: tpu_custom_call.1
= control target key start
LH: loop header
LB: loop body
LE: loop exit
PB: predicated region body
PF: predicated region fallthrough
CT: control target
= control target key end

     0   :  { %12 = vsyncpa [#allocation3], 0  ;;  %s1355_s0 = inlined_call_operand.hbm [shape: f32[2,8,32], index: 0, kind: input, shape index: {}]   ;;  %s1356_s1 = inlined_call_operand.hbm [shape: f32[2,8,32], index: 1, kind: input, shape index: {}]   ;;  %s1357_s2 = inlined_call_operand.hbm [shape: f32[2,8,32], index: 2, kind: input, shape index: {}]   ;;  %s1358_s3 = inlined_call_operand.hbm [shape: f32[32,128], index: 3, kind: input, shape index: {}]   ;;  %s1359_s4 = inlined_call_operand.vmem [shape: f32[1,128], index: 4, kind: input, shape index: {}]   ;;  %s1360_s5 = inlined_call_operand.hbm [shape: f32[2,4,8,8], index: 5, kind: output, shape index: {0}]   ;;  %s1361_s6 = inlined_call_operand.hbm [shape: f32[2,8,32], index: 6, kind: output, shape index: {1}]  }
   0x1   :  { %13 = vsyncpa [#allocation6], 0 }
   0x2   :  { %14 = vsyncpa [#allocation9], 0 }
   0x3   :  { %15 = vsyncpa [#allocation4], 0 }
   0x4   :  { %16 = vsyncpa [#allocation12], 0  ;;  %s34_s23 = sshll.u32 %s1356_s1, 4  ;;  %s1109_s24 = smov [#allocation5]   ;;  %s35_s23 = int_to_ptr.hbm [resolvable:$true] %s34_s23 }
   0x5   :  { %s36_s25 = sshll.u32 %s1109_s24, 4  ;;  %s21_s28 = sshll.u32 %s1355_s0, 4  ;;  %s37_s25 = int_to_ptr.vmem [resolvable:$true] %s36_s25  ;;  %s22_s28 = int_to_ptr.hbm [resolvable:$true] %s21_s28 }
   0x6   :  { %s1110_s29 = smov 128   ;;  %s1111_s30 = smov 8  }
   0x7   :  { %42 = dma.hbm_to_vmem [thread:$0]  %s35_s23, 256, %s37_s25, [#allocation6], %s1110_s29, %s1110_s29, %s1111_s30  }
   0x8   :  { %s1112_s7 = smov [#allocation2]   ;;  %s47_s1 = sshll.u32 %s1357_s2, 4  ;;  %s48_s1 = int_to_ptr.hbm [resolvable:$true] %s47_s1 }
   0x9   :  { %s23_s8 = sshll.u32 %s1112_s7, 4  ;;  %s60_s12 = sshll.u32 %s1358_s3, 4  ;;  %s24_s8 = int_to_ptr.vmem [resolvable:$true] %s23_s8  ;;  %s61_s12 = int_to_ptr.hbm [resolvable:$true] %s60_s12 }
   0xa   :  { %29 = dma.hbm_to_vmem [thread:$0]  %s22_s28, 256, %s24_s8, [#allocation3], %s1110_s29, %s1110_s29, %s1111_s30  }
   0xb   :  { %s1113_s13 = smov [#allocation7]   ;;  %s1114_s15 = smov [#allocation8]  }
   0xc   :  { %s49_s14 = sshll.u32 %s1113_s13, 4  ;;  %s62_s2 = sshll.u32 %s1114_s15, 4  ;;  %s50_s14 = int_to_ptr.vmem [resolvable:$true] %s49_s14  ;;  %s63_s2 = int_to_ptr.vmem [resolvable:$true] %s62_s2 }
   0xd   :  { %55 = dma.hbm_to_vmem [thread:$0]  %s48_s1, 256, %s50_s14, [#allocation6], %s1110_s29, %s1110_s29, %s1111_s30  }
   0xe   :  { %68 = dma.hbm_to_vmem [thread:$0]  %s61_s12, 512, %s63_s2, [#allocation9], %s1110_s29, %s1110_s29, %s1111_s30  }
   0xf   :  { %1099 = dma.done.wait [#allocation3], 256  }
  0x10   :  { %1100 = vsyncadd [#allocation3], 4294967040 }
  0x11   :  { %1101 = dma.done.wait [#allocation6], 512  }
  0x12   :  { %1102 = vsyncadd [#allocation6], 4294966784 }
  0x13   :  { %1103 = dma.done.wait [#allocation9], 512  }
  0x14   :  { %1104 = vsyncadd [#allocation9], 4294966784  ;;  %v1184_v0 = vld [vmem:[#allocation8 + $0x18] sm:$0xff]  ;;  %v1186_v1 = vld [vmem:[#allocation8 + $0x10] sm:$0xff]  ;;  %vm101_vm0 = vcmask 261120   ;;  %s1115_s17 = smov 104  }
  0x15   :  { %132 = vmatpush.msra.mxu0 %v1184_v0  ;;  %v1189_v2 = vld [vmem:[#allocation8 + $0x8] sm:$0xff]  ;;  %v1192_v3 = vld [vmem:[#allocation8] sm:$0xff]  ;;  %v92_v4 = vld [vmem:[#allocation2] sm:$0xff]  ;;  %s1116_s18 = smov 120   ;;  %s1117_s19 = smov 112   ;;  %vm199_vm1 = vcmask 64512  }
  0x16   :  { %v93_v5 = vld [vmem:[#allocation2 + $0x8] sm:$0xff]  ;;  %v94_v6 = vld [vmem:[#allocation5] sm:$0xff]  ;;  %v95_v7 = vld [vmem:[#allocation5 + $0x8] sm:$0xff]  ;;  %s1119_s20 = smov 64   ;;  %s1120_s21 = smov 16   ;;  %vm760_vm2 = vcmask 130048  }
  0x17   :  { %133 = vmatpush.msra.mxu0 %v1186_v1  ;;  %v1203_v10 = vld [vmem:[%s1359_s4] ss:$0 sm:$0xff]  ;;  %s1118_s4 = smov 96   ;;  %v97_v19 = vld [vmem:[#allocation7 + $0x8] sm:$0xff]  ;;  %s1121_s22 = smov 24   ;;  %vm763_vm3 = vcmask 195584  }
  0x18   :  { %v96_v17 = vld [vmem:[#allocation7] sm:$0xff]  ;;  %s1122_s23 = smov 32   ;;  %s1123_s24 = smov [#allocation10]  }
  0x19   :  { %134 = vmatpush.msra.mxu0 %v1189_v2  ;;  %s809_s25 = sshll.u32 %s1123_s24, 4  ;;  %s811_s28 = sshll.u32 %s1360_s5, 4  ;;  %s810_s25 = int_to_ptr.vmem [resolvable:$true] %s809_s25  ;;  %s812_s28 = int_to_ptr.hbm [resolvable:$true] %s811_s28 }
  0x1a   :  { %s1124_s7 = smov [#allocation11]   ;;  %s824_s1 = sshll.u32 %s1361_s6, 4  ;;  %s825_s1 = int_to_ptr.hbm [resolvable:$true] %s824_s1 }
  0x1b   :  { %135 = vmatpush.msra.mxu0 %v1192_v3  ;;  %s822_s8 = sshll.u32 %s1124_s7, 4  ;;  %s823_s8 = int_to_ptr.vmem [resolvable:$true] %s822_s8 }
  0x1c   :  { %844 = vmatmul.msk.f32.vlgmr.msra.gmra.mxu0 %vm101_vm0, %v92_v4 }
  0x24   :  { %845 = vmatmul.msk.f32.gmra.mxu0 %vm101_vm0, %v93_v5 }
  0x2c   :  { %846 = vmatmul.msk.f32.gmra.mxu0 %vm101_vm0, %v94_v6 }
  0x34   :  { %847 = vmatmul.msk.f32.gmra.mxu0 %vm101_vm0, %v95_v7 }
  0x3c   :  { %848 = vmatmul.msk.f32.gmra.mxu0 %vm101_vm0, %v96_v17 }
  0x44   :  { %849 = vmatmul.msk.f32.gmra.mxu0 %vm101_vm0, %v97_v19 }
  0x99   :  { %v137_v8 = vpop.f32.mrf.mxu0 }
  0x9a   :  { %v138_v15 = vadd.f32 %v1203_v10, %v137_v8 }
  0xa1   :  { %v140_v9 = vpop.f32.mrf.mxu0 }
  0xa2   :  { %v141_v25 = vadd.f32 %v1203_v10, %v140_v9 }
  0xa9   :  { %v143_v11 = vpop.f32.mrf.mxu0 }
  0xaa   :  { %v144_v12 = vadd.f32 %v1203_v10, %v143_v11 }
  0xac   :  { %179 = vrot.lane.b32.xlu1 %v144_v12, %s1115_s17  ;;  %171 = vrot.lane.b32.xlu0 %v144_v12, %s1116_s18 }
  0xb1   :  { %v146_v13 = vpop.f32.mrf.mxu0 }
  0xb2   :  { %v147_v14 = vadd.f32 %v1203_v10, %v146_v13 }
  0xb4   :  { %177 = vrot.lane.b32.xlu2 %v147_v14, %s1117_s19  ;;  %173 = vrot.lane.b32.xlu1 %v147_v14, %s1116_s18 }
  0xb5   :  { %175 = vrot.lane.b32.xlu0 %v144_v12, %s1117_s19 }
  0xb9   :  { %v149_v29 = vpop.f32.mrf.mxu0 }
  0xba   :  { %v150_v32 = vadd.f32 %v1203_v10, %v149_v29 }
  0xbc   :  { %181 = vrot.lane.b32.xlu2 %v147_v14, %s1115_s17  ;;  %157 = vrot.lane.b32.xlu1 %v138_v15, %s1116_s18 }
  0xc1   :  { %v152_v33 = vpop.f32.mrf.mxu0 }
  0xc2   :  { %v1231_v34 = vadd.f32 %v1203_v10, %v152_v33 }
  0xc4   :  { %197 = vrot.lane.b32.xlu2 %v144_v12, %s1118_s4  ;;  %161 = vrot.lane.b32.xlu1 %v138_v15, %s1117_s19  ;;  %v892_v36 = vpack.i.bf16 %v1231_v34, %v150_v32 }
 0x10e   :  { %v178_v16 = vpop.permute.xlu2 %177 }
 0x116   :  { %v182_v18 = vpop.permute.xlu2 %181 }
 0x11e   :  { %v198_v20 = vpop.permute.xlu2 %197  ;;  %v180_v21 = vpop.permute.xlu1 %179 }
 0x11f   :  { %v172_v22 = vpop.permute.xlu0 %171  ;;  %850 = vmatpush.xpose.msk.msra.mxu1 %vm199_vm1, %v198_v20  ;;  %276 = vrot.lane.b32.xlu2 %v180_v21, %s1118_s4 }
 0x120   :  { %224 = vrot.lane.b32.xlu0 %v172_v22, %s1118_s4 }
 0x122   :  { %851 = vmatmul.msk.f32.vlgmr.msra.gmra.mxu1 %vm199_vm1, %v138_v15 }
 0x126   :  { %v174_v23 = vpop.permute.xlu1 %173 }
 0x127   :  { %v176_v24 = vpop.permute.xlu0 %175  ;;  %165 = vrot.lane.b32.xlu2 %v138_v15, %s1115_s17  ;;  %328 = vrot.lane.b32.xlu1 %v174_v23, %s1118_s4 }
 0x128   :  { %250 = vrot.lane.b32.xlu0 %v176_v24, %s1118_s4 }
 0x12e   :  { %v158_v28 = vpop.permute.xlu1 %157 }
 0x12f   :  { %380 = vrot.lane.b32.xlu2 %v182_v18, %s1118_s4  ;;  %354 = vrot.lane.b32.xlu1 %v178_v16, %s1118_s4 }
 0x130   :  { %302 = vrot.lane.b32.xlu0 %v147_v14, %s1118_s4 }
 0x136   :  { %v162_v30 = vpop.permute.xlu1 %161 }
 0x137   :  { %167 = vrot.lane.b32.xlu1 %v141_v25, %s1115_s17 }
 0x138   :  { %159 = vrot.lane.b32.xlu0 %v141_v25, %s1116_s18 }
 0x140   :  { %163 = vrot.lane.b32.xlu0 %v141_v25, %s1117_s19 }
 0x148   :  { %893 = vrot.lane.b32.xlu0 %v892_v36, %s1116_s18 }
 0x179   :  { %v277_v26 = vpop.permute.xlu2 %276 }
 0x17a   :  { %856 = vmatpush.xpose.msk.msrb.mxu1 %vm199_vm1, %v277_v26 }
 0x181   :  { %v166_v27 = vpop.permute.xlu2 %165 }
 0x182   :  { %857 = vmatmul.msk.f32.vlgmr.msrb.gmra.mxu1 %vm199_vm1, %v166_v27 }
 0x189   :  { %v381_v42 = vpop.permute.xlu2 %380 }
 0x192   :  { %v225_v31 = vpop.permute.xlu0 %224 }
 0x193   :  { %852 = vmatpush.xpose.msk.msra.mxu3 %vm199_vm1, %v225_v31 }
 0x196   :  { %853 = vmatmul.msk.f32.vlgmr.msra.gmra.mxu3 %vm199_vm1, %v158_v28 }
 0x199   :  { %v329_v35 = vpop.permute.xlu1 %328 }
 0x19a   :  { %v251_v37 = vpop.permute.xlu0 %250 }
 0x19b   :  { %854 = vmatpush.xpose.msk.msrb.mxu3 %vm199_vm1, %v251_v37 }
 0x19e   :  { %855 = vmatmul.msk.f32.vlgmr.msrb.gmra.mxu3 %vm199_vm1, %v162_v30 }
 0x19f   :  { %860 = vmatpush.xpose.msk.msra.mxu3 %vm199_vm1, %v329_v35  ;;  %v221_v38 = vpop.f32.mrf.mxu1 }
 0x1a0   :  { %v406_v39 = vsel %vm199_vm1, %v221_v38, -inf }
 0x1a1   :  { %v355_v40 = vpop.permute.xlu1 %354  ;;  %407 = vmax.xlane.f32.xlu2 %v406_v39 }
 0x1a2   :  { %v303_v41 = vpop.permute.xlu0 %302  ;;  %862 = vmatpush.xpose.msk.msra.mxu1 %vm199_vm1, %v355_v40 }
 0x1a3   :  { %858 = vmatpush.xpose.msk.msra.mxu2 %vm199_vm1, %v303_v41 }
 0x1a6   :  { %859 = vmatmul.msk.f32.vlgmr.msra.gmra.mxu2 %vm199_vm1, %v141_v25 }
 0x1a7   :  { %864 = vmatpush.xpose.msk.msrb.mxu2 %vm199_vm1, %v381_v42 }
 0x1a9   :  { %v168_v44 = vpop.permute.xlu1 %167 }
 0x1aa   :  { %v160_v43 = vpop.permute.xlu0 %159 }
 0x1ab   :  { %861 = vmatmul.msk.f32.vlgmr.msra.gmra.mxu3 %vm199_vm1, %v160_v43 }
 0x1ae   :  { %865 = vmatmul.msk.f32.vlgmr.msrb.gmra.mxu2 %vm199_vm1, %v168_v44 }
 0x1b2   :  { %v164_v45 = vpop.permute.xlu0 %163 }
 0x1b3   :  { %863 = vmatmul.msk.f32.vlgmr.msra.gmra.mxu1 %vm199_vm1, %v164_v45 }
 0x1ba   :  { %v1262_v5 = vpop.permute.xlu0 %893 }
 0x1bb   :  { %v895_v6 = vunpack.i.l.bf16 %v1262_v5 }
 0x1bd   :  { %v907_v7 = vpack.i.bf16 %v895_v6, %v150_v32 }
 0x1ff   :  { %v1248_v54 = vpop.f32.mrf.mxu1 }
 0x200   :  { %v415_v61 = vsel %vm199_vm1, %v1248_v54, -inf }
 0x214   :  { %v408_v46 = vpop.xlane.xlu2 %407 }
 0x215   :  { %v430_v47 = vsub.f32 %v221_v38, %v408_v46 }
 0x217   :  { %v438_v48 = vmul.f32 1.442695, %v430_v47 }
 0x219   :  { %923 = vpow2.f32 %v438_v48  ;;  %v247_v49 = vpop.f32.mrf.mxu3 }
 0x21a   :  { %v409_v50 = vsel %vm199_vm1, %v247_v49, -inf }
 0x21b   :  { %410 = vmax.xlane.f32.xlu0 %v409_v50 }
 0x21f   :  { %v924_v51 = vpop.eup %923 }
 0x220   :  { %v454_v52 = vsel %vm199_vm1, %v924_v51, 0.0 }
 0x221   :  { %v273_v53 = vpop.f32.mrf.mxu3 }
 0x222   :  { %v412_v62 = vsel %vm199_vm1, %v273_v53, -inf }
 0x223   :  { %455 = vadd.xlane.f32.xlu0 %v454_v52 }
 0x229   :  { %v325_v55 = vpop.f32.mrf.mxu2 }
 0x22a   :  { %v418_v56 = vsel %vm199_vm1, %v325_v55, -inf }
 0x22b   :  { %419 = vmax.xlane.f32.xlu2 %v418_v56 }
 0x22e   :  { %v1251_v57 = vpop.f32.mrf.mxu3 }
 0x22f   :  { %v421_v58 = vsel %vm199_vm1, %v1251_v57, -inf }
 0x230   :  { %422 = vmax.xlane.f32.xlu0 %v421_v58  ;;  %v377_v59 = vpop.f32.mrf.mxu1 }
 0x231   :  { %v424_v60 = vsel %vm199_vm1, %v377_v59, -inf  ;;  %v403_v63 = vpop.f32.mrf.mxu2 }
 0x232   :  { %425 = vmax.xlane.f32.xlu1 %v424_v60  ;;  %v427_v4 = vsel %vm199_vm1, %v403_v63, -inf  ;;  %v896_v60 = vunpack.i.h.bf16 %v1262_v5 }
 0x233   :  { %416 = vmax.xlane.f32.xlu2 %v415_v61 }
 0x234   :  { %v917_v61 = vpack.i.bf16 %v896_v60, %v1231_v34 }
 0x23a   :  { %413 = vmax.xlane.f32.xlu1 %v412_v62 }
 0x24b   :  { %903 = vrot.lane.b32.xlu2 %v892_v36, %s1115_s17 }
 0x253   :  { %898 = vrot.lane.b32.xlu1 %v892_v36, %s1117_s19 }
 0x274   :  { %428 = vmax.xlane.f32.xlu2 %v427_v4 }
 0x28c   :  { %908 = vrot.lane.b32.xlu2 %v907_v7, %s1119_s20 }
 0x28e   :  { %v411_v8 = vpop.xlane.xlu0 %410 }
 0x28f   :  { %v431_v16 = vsub.f32 %v247_v49, %v411_v8 }
 0x291   :  { %v440_v20 = vmul.f32 1.442695, %v431_v16 }
 0x296   :  { %v456_v9 = vpop.xlane.xlu0 %455 }
 0x297   :  { %925 = vrcp.f32 %v456_v9 }
 0x29d   :  { %v926_v11 = vpop.eup %925 }
 0x29e   :  { %v486_v12 = vmul.f32 %v926_v11, %v456_v9  ;;  %v420_v13 = vpop.xlane.xlu2 %419 }
 0x29f   :  { %v434_v14 = vsub.f32 %v325_v55, %v420_v13 }
 0x2a0   :  { %v494_v15 = vsub.f32 2.0, %v486_v12 }
 0x2a1   :  { %v446_v17 = vmul.f32 1.442695, %v434_v14 }
 0x2a2   :  { %v502_v18 = vmul.f32 %v926_v11, %v494_v15 }
 0x2a3   :  { %927 = vpow2.f32 %v446_v17  ;;  %v423_v45 = vpop.xlane.xlu0 %422 }
 0x2a4   :  { %v510_v19 = vmul.f32 %v924_v51, %v502_v18  ;;  %929 = vpow2.f32 %v440_v20  ;;  %v435_v48 = vsub.f32 %v1251_v57, %v423_v45 }
 0x2a5   :  { %v426_v21 = vpop.xlane.xlu1 %425 }
 0x2a6   :  { %518 = vst.msk [vmem:[#allocation10] sm:$0xff] %vm199_vm1, %v510_v19  ;;  %v436_v23 = vsub.f32 %v377_v59, %v426_v21  ;;  %v417_v33 = vpop.xlane.xlu2 %416  ;;  %v448_v50 = vmul.f32 1.442695, %v435_v48 }
 0x2a7   :  { %v433_v43 = vsub.f32 %v1248_v54, %v417_v33 }
 0x2a8   :  { %v450_v25 = vmul.f32 1.442695, %v436_v23 }
 0x2a9   :  { %v1267_v22 = vpop.eup %927  ;;  %v444_v44 = vmul.f32 1.442695, %v433_v43 }
 0x2aa   :  { %v466_v24 = vsel %vm199_vm1, %v1267_v22, 0.0  ;;  %v1271_v28 = vpop.eup %929  ;;  %931 = vpow2.f32 %v450_v25 }
 0x2ab   :  { %467 = vadd.xlane.f32.xlu1 %v466_v24  ;;  %v457_v30 = vsel %vm199_vm1, %v1271_v28, 0.0 }
 0x2ad   :  { %v414_v26 = vpop.xlane.xlu1 %413 }
 0x2ae   :  { %v432_v27 = vsub.f32 %v273_v53, %v414_v26  ;;  %v904_v37 = vpop.permute.xlu2 %903 }
 0x2af   :  { %v905_v39 = vunpack.i.l.bf16 %v904_v37  ;;  %v906_v62 = vunpack.i.h.bf16 %v904_v37 }
 0x2b0   :  { %v442_v29 = vmul.f32 1.442695, %v432_v27  ;;  %v1275_v31 = vpop.eup %931 }
 0x2b1   :  { %v472_v36 = vsel %vm199_vm1, %v1275_v31, 0.0 }
 0x2b2   :  { %933 = vpow2.f32 %v442_v29 }
 0x2b3   :  { %458 = vadd.xlane.f32.xlu1 %v457_v30  ;;  %935 = vpow2.f32 %v444_v44 }
 0x2b8   :  { %v1277_v32 = vpop.eup %933 }
 0x2b9   :  { %v460_v35 = vsel %vm199_vm1, %v1277_v32, 0.0  ;;  %v1287_v52 = vpop.eup %935 }
 0x2ba   :  { %461 = vadd.xlane.f32.xlu2 %v460_v35  ;;  %v463_v57 = vsel %vm199_vm1, %v1287_v52, 0.0 }
 0x2bb   :  { %473 = vadd.xlane.f32.xlu1 %v472_v36 }
 0x2c5   :  { %v899_v38 = vpop.permute.xlu1 %898 }
 0x2c6   :  { %v900_v40 = vunpack.i.l.bf16 %v899_v38  ;;  %v901_v42 = vunpack.i.h.bf16 %v899_v38 }
 0x2c8   :  { %v912_v41 = vpack.i.bf16 %v905_v39, %v900_v40 }
 0x2ca   :  { %913 = vrot.lane.b32.xlu0 %v912_v41, %s1119_s20 }
 0x2d2   :  { %682 = vrot.lane.b32.xlu2 %v901_v42, %s1119_s20 }
 0x2e7   :  { %v429_v46 = vpop.xlane.xlu2 %428 }
 0x2e8   :  { %v437_v47 = vsub.f32 %v403_v63, %v429_v46 }
 0x2ea   :  { %v452_v49 = vmul.f32 1.442695, %v437_v47 }
 0x2ec   :  { %937 = vpow2.f32 %v452_v49 }
 0x2ed   :  { %939 = vpow2.f32 %v448_v50 }
 0x2ef   :  { %v909_v51 = vpop.permute.xlu2 %908 }
 0x2f0   :  { %v911_v53 = vunpack.i.h.bf16 %v909_v51  ;;  %v910_v55 = vunpack.i.l.bf16 %v909_v51 }
 0x2f2   :  { %v1289_v56 = vpop.eup %937  ;;  %547 = vmatpush.msrb.mxu3 %v910_v55  ;;  %573 = vmatpush.msrb.mxu1 %v911_v53 }
 0x2f3   :  { %866 = vmatmul.msk.f32.vlgmr.msrb.gmra.mxu3 %vm199_vm1, %v510_v19  ;;  %v475_v54 = vsel %vm199_vm1, %v1289_v56, 0.0  ;;  %v1296_v58 = vpop.eup %939 }
 0x2f4   :  { %476 = vadd.xlane.f32.xlu1 %v475_v54  ;;  %464 = vadd.xlane.f32.xlu0 %v463_v57  ;;  %v469_v59 = vsel %vm199_vm1, %v1296_v58, 0.0 }
 0x2fc   :  { %470 = vadd.xlane.f32.xlu0 %v469_v59 }
 0x30d   :  { %918 = vrot.lane.b32.xlu1 %v917_v61, %s1119_s20 }
 0x310   :  { %708 = vrot.lane.b32.xlu0 %v906_v62, %s1119_s20 }
 0x31e   :  { %v468_v63 = vpop.xlane.xlu1 %467 }
 0x31f   :  { %941 = vrcp.f32 %v468_v63 }
 0x325   :  { %v942_v4 = vpop.eup %941 }
 0x326   :  { %v490_v6 = vmul.f32 %v942_v4, %v468_v63  ;;  %v459_v7 = vpop.xlane.xlu1 %458 }
 0x327   :  { %943 = vrcp.f32 %v459_v7 }
 0x328   :  { %v498_v8 = vsub.f32 2.0, %v490_v6 }
 0x32a   :  { %v506_v9 = vmul.f32 %v942_v4, %v498_v8 }
 0x32c   :  { %v1305_v11 = vmul.f32 %v1267_v22, %v506_v9 }
 0x32d   :  { %v944_v12 = vpop.eup %943  ;;  %v462_v5 = vpop.xlane.xlu2 %461 }
 0x32e   :  { %522 = vst.msk [vmem:[#allocation10 + $0x20] sm:$0xff] %vm199_vm1, %v1305_v11  ;;  %v487_v34 = vmul.f32 %v944_v12, %v459_v7  ;;  %945 = vrcp.f32 %v462_v5  ;;  %v474_v13 = vpop.xlane.xlu1 %473 }
 0x32f   :  { %947 = vrcp.f32 %v474_v13 }
 0x330   :  { %v495_v14 = vsub.f32 2.0, %v487_v34 }
 0x332   :  { %v503_v15 = vmul.f32 %v944_v12, %v495_v14 }
 0x334   :  { %v946_v16 = vpop.eup %945  ;;  %v511_v17 = vmul.f32 %v1271_v28, %v503_v15 }
 0x335   :  { %v948_v18 = vpop.eup %947  ;;  %v488_v19 = vmul.f32 %v946_v16, %v462_v5  ;;  %v683_v30 = vpop.permute.xlu2 %682 }
 0x336   :  { %519 = vst.msk [vmem:[#allocation10 + $0x8] sm:$0xff] %vm199_vm1, %v511_v17  ;;  %v492_v20 = vmul.f32 %v948_v18, %v474_v13  ;;  %867 = vmatmul.msk.f32.vlgmr.msrb.gmra.mxu1 %vm199_vm1, %v511_v17 }
 0x337   :  { %v496_v21 = vsub.f32 2.0, %v488_v19 }
 0x338   :  { %v500_v22 = vsub.f32 2.0, %v492_v20 }
 0x339   :  { %v504_v23 = vmul.f32 %v946_v16, %v496_v21 }
 0x33a   :  { %v508_v24 = vmul.f32 %v948_v18, %v500_v22 }
 0x33b   :  { %v512_v25 = vmul.f32 %v1277_v32, %v504_v23 }
 0x33c   :  { %v516_v26 = vmul.f32 %v1275_v31, %v508_v24  ;;  %v914_v27 = vpop.permute.xlu0 %913 }
 0x33d   :  { %520 = vst.msk [vmem:[#allocation10 + $0x10] sm:$0xff] %vm199_vm1, %v512_v25  ;;  %v916_v29 = vunpack.i.h.bf16 %v914_v27  ;;  %v915_v28 = vunpack.i.l.bf16 %v914_v27 }
 0x33e   :  { %524 = vst.msk [vmem:[#allocation10 + $0x30] sm:$0xff] %vm199_vm1, %v516_v26 }
 0x33f   :  { %599 = vmatpush.msra.mxu2 %v915_v28  ;;  %625 = vmatpush.msra.mxu3 %v916_v29 }
 0x340   :  { %868 = vmatmul.msk.f32.vlgmr.msra.gmra.mxu2 %vm199_vm1, %v512_v25 }
 0x341   :  { %703 = vmatpush.msrb.mxu3 %v683_v30 }
 0x367   :  { %v477_v33 = vpop.xlane.xlu1 %476  ;;  %v465_v35 = vpop.xlane.xlu0 %464 }
 0x368   :  { %949 = vrcp.f32 %v477_v33 }
 0x369   :  { %951 = vrcp.f32 %v465_v35 }
 0x36e   :  { %v950_v32 = vpop.eup %949 }
 0x36f   :  { %v952_v36 = vpop.eup %951  ;;  %v493_v31 = vmul.f32 %v950_v32, %v477_v33  ;;  %v471_v37 = vpop.xlane.xlu0 %470 }
 0x370   :  { %v489_v38 = vmul.f32 %v952_v36, %v465_v35  ;;  %953 = vrcp.f32 %v471_v37 }
 0x371   :  { %v501_v39 = vsub.f32 2.0, %v493_v31 }
 0x372   :  { %v497_v40 = vsub.f32 2.0, %v489_v38 }
 0x373   :  { %v509_v41 = vmul.f32 %v950_v32, %v501_v39 }
 0x374   :  { %v505_v42 = vmul.f32 %v952_v36, %v497_v40 }
 0x375   :  { %v517_v43 = vmul.f32 %v1289_v56, %v509_v41 }
 0x376   :  { %v954_v44 = vpop.eup %953  ;;  %v513_v45 = vmul.f32 %v1287_v52, %v505_v42  ;;  %v549_v54 = vpop.f32.mrf.mxu3 }
 0x377   :  { %525 = vst.msk [vmem:[#allocation10 + $0x38] sm:$0xff] %vm199_vm1, %v517_v43  ;;  %v491_v46 = vmul.f32 %v954_v44, %v471_v37 }
 0x378   :  { %521 = vst.msk [vmem:[#allocation10 + $0x18] sm:$0xff] %vm199_vm1, %v513_v45  ;;  %869 = vmatmul.msk.f32.vlgmr.msra.gmra.mxu3 %vm199_vm1, %v513_v45 }
 0x379   :  { %v499_v47 = vsub.f32 2.0, %v491_v46 }
 0x37b   :  { %v507_v48 = vmul.f32 %v954_v44, %v499_v47 }
 0x37d   :  { %v515_v49 = vmul.f32 %v1296_v58, %v507_v48 }
 0x37f   :  { %523 = vst.msk [vmem:[#allocation10 + $0x28] sm:$0xff] %vm199_vm1, %v515_v49  ;;  %v919_v50 = vpop.permute.xlu1 %918 }
 0x380   :  { %v921_v51 = vunpack.i.h.bf16 %v919_v50  ;;  %v920_v53 = vunpack.i.l.bf16 %v919_v50  ;;  %872 = vmatmul.msk.f32.vlgmr.msrb.gmra.mxu3 %vm199_vm1, %v516_v26  ;;  %817 = dma.vmem_to_hbm [thread:$0]  %s810_s25, 1024, %s812_s28, [#allocation4], %s1110_s29, %s1110_s29, %s1111_s30  }
 0x382   :  { %651 = vmatpush.msra.mxu1 %v920_v53  ;;  %v709_v52 = vpop.permute.xlu0 %708  ;;  %677 = vmatpush.msrb.mxu2 %v921_v51 }
 0x383   :  { %870 = vmatmul.msk.f32.vlgmr.msra.gmra.mxu1 %vm199_vm1, %v1305_v11  ;;  %871 = vmatmul.msk.f32.vlgmr.msrb.gmra.mxu2 %vm199_vm1, %v515_v49 }
 0x384   :  { %729 = vmatpush.msrb.mxu1 %v709_v52  ;;  %784 = vmatpush.msra.mxu2 %v1184_v0 }
 0x386   :  { %785 = vmatpush.msra.mxu2 %v1186_v1 }
 0x388   :  { %786 = vmatpush.msra.mxu2 %v1189_v2 }
 0x38a   :  { %787 = vmatpush.msra.mxu2 %v1192_v3 }
 0x38b   :  { %873 = vmatmul.msk.f32.vlgmr.msrb.gmra.mxu1 %vm199_vm1, %v517_v43 }
 0x3b3   :  { %v575_v55 = vpop.f32.mrf.mxu1 }
 0x3b4   :  { %736 = vrot.lane.b32.xlu2 %v575_v55, %s1111_s30 }
 0x3c3   :  { %v601_v56 = vpop.f32.mrf.mxu2 }
 0x3c4   :  { %744 = vrot.lane.b32.xlu0 %v601_v56, %s1120_s21 }
 0x3fb   :  { %v627_v57 = vpop.f32.mrf.mxu3 }
 0x3fc   :  { %752 = vrot.lane.b32.xlu2 %v627_v57, %s1121_s22 }
 0x400   :  { %v653_v58 = vpop.f32.mrf.mxu1 }
 0x403   :  { %v705_v0 = vpop.f32.mrf.mxu3 }
 0x404   :  { %746 = vrot.lane.b32.xlu1 %v705_v0, %s1120_s21 }
 0x406   :  { %v679_v1 = vpop.f32.mrf.mxu2 }
 0x407   :  { %738 = vrot.lane.b32.xlu0 %v679_v1, %s1111_s30 }
 0x408   :  { %v731_v2 = vpop.f32.mrf.mxu1 }
 0x409   :  { %754 = vrot.lane.b32.xlu2 %v731_v2, %s1121_s22 }
 0x40e   :  { %v737_v3 = vpop.permute.xlu2 %736 }
 0x40f   :  { %v758_v60 = vsel %vm199_vm1, %v549_v54, %v737_v3 }
 0x436   :  { %v745_v59 = vpop.permute.xlu0 %744 }
 0x437   :  { %v761_v61 = vsel %vm760_vm2, %v758_v60, %v745_v59 }
 0x456   :  { %v753_v62 = vpop.permute.xlu2 %752 }
 0x457   :  { %v764_v63 = vsel %vm763_vm3, %v761_v61, %v753_v62 }
 0x458   :  { %874 = vmatmul.msk.f32.vlgmr.msra.gmra.mxu2 %vm101_vm0, %v764_v63 }
 0x463   :  { %v755_v8 = vpop.permute.xlu2 %754 }
 0x476   :  { %v747_v6 = vpop.permute.xlu1 %746 }
 0x479   :  { %v739_v4 = vpop.permute.xlu0 %738 }
 0x47a   :  { %v759_v7 = vsel %vm199_vm1, %v653_v58, %v739_v4 }
 0x47b   :  { %v762_v9 = vsel %vm760_vm2, %v759_v7, %v747_v6 }
 0x47c   :  { %v765_v11 = vsel %vm763_vm3, %v762_v9, %v755_v8 }
 0x47d   :  { %875 = vmatmul.msk.f32.gmra.mxu2 %vm101_vm0, %v765_v11 }
 0x4db   :  { %v789_v12 = vpop.f32.mrf.mxu2 }
 0x4dc   :  { %v790_v5 = vadd.f32 %v1203_v10, %v789_v12 }
 0x4de   :  { %797 = vrot.lane.b32.xlu0 %v790_v5, %s1122_s23 }
 0x500   :  { %v792_v34 = vpop.f32.mrf.mxu2 }
 0x501   :  { %v793_v13 = vadd.f32 %v1203_v10, %v792_v34 }
 0x503   :  { %799 = vrot.lane.b32.xlu1 %v793_v13, %s1122_s23 }
 0x550   :  { %v798_v14 = vpop.permute.xlu0 %797 }
 0x551   :  { %803 = vst.msk [vmem:[#allocation11] sm:$0xff] %vm101_vm0, %v798_v14 }
 0x575   :  { %v800_v15 = vpop.permute.xlu1 %799 }
 0x576   :  { %804 = vst.msk [vmem:[#allocation11 + $0x8] sm:$0xff] %vm101_vm0, %v800_v15 }
 0x577   :  { %830 = dma.vmem_to_hbm [thread:$0]  %s823_s8, 256, %s825_s1, [#allocation12], %s1110_s29, %s1110_s29, %s1111_s30  }
 0x578   :  { %1105 = dma.done.wait [#allocation4], 1024  }
 0x579   :  { %1106 = vsyncadd [#allocation4], 4294966272 }
 0x57a   :  { %1107 = dma.done.wait [#allocation12], 256  }
 0x57b   :  { %1108 = vsyncadd [#allocation12], 4294967040 }
 0x57c   :  { %839 = vsyncpa [#allocation3], 1 }
 0x57d   :  { %840 = vsyncpa [#allocation6], 1 }
 0x57e   :  { %841 = vsyncpa [#allocation9], 1 }
 0x57f   :  { %842 = vsyncpa [#allocation4], 1 }
 0x580   :  { %843 = vsyncpa [#allocation12], 1 }

</bundles_post_ra>
